<compile_context>
chip_gen: v5e
topology: v5e:2x2
jax: 0.10.0
libtpu: 0.0.40
codegen_flags: <defaults>
</compile_context>

<pallas_src>
import jax
import jax.numpy as jnp
from jax.experimental import pallas as pl
from jax.experimental.pallas import tpu as pltpu

# ----- config (small, consistent with the module) ---------------------------
N_INST  = 64    # instances (patches) per bag
D_FEAT  = 64    # conf.feat_d
D_INNER = 32    # conf.D_inner
D_ATTN  = 128   # Attention_Gated hidden dim D
N_TOKEN = 4     # conf.n_token
N_CLASS = 2     # conf.n_class


def _sigmoid(x):
    # explicit form (exp + divide) to keep the lowering simple and f32 on the VPU/EUP
    return 1.0 / (1.0 + jnp.exp(-x))


# ----- single fused kernel ---------------------------------------------------
def _attnmil2_kernel(x_ref, wdr_ref,
                     wvu1_ref, bvu1_ref, wa1_ref, ba1_ref,
                     wcls_ref, bcls_ref,
                     wvu2_ref, bvu2_ref, wa2_ref, ba2_ref,
                     wsc_ref, bsc_ref,
                     tok_ref, slide_ref, aout_ref):
    f32 = jnp.float32

    # ---- DimReduction: Linear(feat_d -> D_inner, bias=False) + ReLU ----
    med = jnp.maximum(
        jnp.dot(x_ref[...], wdr_ref[...], preferred_element_type=f32), 0.0)    # (N, D_inner)

    # ---- Attention_Gated #1 (K = n_token) ----
    # fused [V | U] projection: one (N, D_inner) @ (D_inner, 2*D_attn) matmul
    g1 = jnp.dot(med, wvu1_ref[...], preferred_element_type=f32) + bvu1_ref[...]
    gated1 = jnp.tanh(g1[:, :D_ATTN]) * _sigmoid(g1[:, D_ATTN:])                # (N, D_attn)
    # logits directly in (n_token, N) layout: contract both operands on D_attn (trans-B dot)
    a_tn = jax.lax.dot_general(
        wa1_ref[...], gated1, (((1,), (1,)), ((), ())),
        preferred_element_type=f32) + ba1_ref[...]                              # (T, N)
    aout_ref[...] = a_tn                                                        # pre-softmax A_out

    # softmax over instances (lane axis)
    m1 = jnp.max(a_tn, axis=-1, keepdims=True)
    e1 = jnp.exp(a_tn - m1)
    p1 = e1 * pl.reciprocal(jnp.sum(e1, axis=-1, keepdims=True), approx=True)   # (T, N)

    afeat = jnp.dot(p1, med, preferred_element_type=f32)                        # (T, D_inner)

    # ---- per-token 1-fc classifiers: VPU multiply + lane reduction, batched over tokens ----
    cols = []
    for c in range(N_CLASS):                                                    # C = 2
        cols.append(jnp.sum(afeat * wcls_ref[c], axis=-1, keepdims=True))       # (T, 1)
    tok_ref[...] = jnp.concatenate(cols, axis=-1) + bcls_ref[...]               # (T, C)

    # ---- Attention_Gated #2 (K = 1) over the n_token aggregated features ----
    g2 = jnp.dot(afeat, wvu2_ref[...], preferred_element_type=f32) + bvu2_ref[...]
    gated2 = jnp.tanh(g2[:, :D_ATTN]) * _sigmoid(g2[:, D_ATTN:])                # (T, D_attn)
    a2 = jax.lax.dot_general(
        wa2_ref[...], gated2, (((1,), (1,)), ((), ())),
        preferred_element_type=f32) + ba2_ref[...]                              # (1, T)
    m2 = jnp.max(a2, axis=-1, keepdims=True)
    e2 = jnp.exp(a2 - m2)
    p2 = e2 * pl.reciprocal(jnp.sum(e2, axis=-1, keepdims=True), approx=True)   # (1, T)

    bag = jnp.dot(p2, afeat, preferred_element_type=f32)                        # (1, D_inner)

    # ---- slide classifier ----
    slide_ref[...] = (jnp.dot(bag, wsc_ref[...], preferred_element_type=f32)
                      + bsc_ref[...])                                           # (1, C)


# ----- parameters (deterministic, in-script) ---------------------------------
def init_params(key):
    ks = jax.random.split(key, 8)
    f32 = jnp.float32
    s = 0.05
    p = {}
    # DimReduction: Linear(feat_d -> D_inner, bias=False)   [(in, out) layout]
    p["w_dr"] = jax.random.normal(ks[0], (D_FEAT, D_INNER), f32) * s
    # Attention_Gated #1: fused [attention_V | attention_U] weights (in, out) + biases
    p["wvu1"] = jax.random.normal(ks[1], (D_INNER, 2 * D_ATTN), f32) * s
    p["bvu1"] = jnp.zeros((1, 2 * D_ATTN), f32)
    p["wa1"]  = jax.random.normal(ks[2], (N_TOKEN, D_ATTN), f32) * s    # (out, in) = PyTorch layout
    p["ba1"]  = jnp.zeros((N_TOKEN, 1), f32)
    # per-token classifiers (Classifier_1fc), stacked per class: (C, T, D_inner)
    p["w_cls"] = jax.random.normal(ks[3], (N_CLASS, N_TOKEN, D_INNER), f32) * s
    p["b_cls"] = jnp.zeros((N_TOKEN, N_CLASS), f32)
    # Attention_Gated #2 (K = 1)
    p["wvu2"] = jax.random.normal(ks[4], (D_INNER, 2 * D_ATTN), f32) * s
    p["bvu2"] = jnp.zeros((1, 2 * D_ATTN), f32)
    p["wa2"]  = jax.random.normal(ks[5], (1, D_ATTN), f32) * s          # (out, in)
    p["ba2"]  = jnp.zeros((1, 1), f32)
    # slide classifier
    p["w_sc"] = jax.random.normal(ks[6], (D_INNER, N_CLASS), f32) * s
    p["b_sc"] = jnp.zeros((1, N_CLASS), f32)
    return p


# ----- forward ----------------------------------------------------------------
def attnmil2_forward(params, x, is_train=False):
    """x: (1, N, feat_d) float32.  Returns (token_logits, slide_logits, A_out)."""
    del is_train  # n_masked_patch == 0 -> masking branch is dead code
    x2 = x[0]                                                         # (N, feat_d)

    vmem = pl.BlockSpec(memory_space=pltpu.MemorySpace.VMEM)
    args = (x2, params["w_dr"],
            params["wvu1"], params["bvu1"], params["wa1"], params["ba1"],
            params["w_cls"], params["b_cls"],
            params["wvu2"], params["bvu2"], params["wa2"], params["ba2"],
            params["w_sc"], params["b_sc"])

    token_logits, slide_logits, a_out = pl.pallas_call(
        _attnmil2_kernel,
        out_shape=(jax.ShapeDtypeStruct((N_TOKEN, N_CLASS), jnp.float32),
                   jax.ShapeDtypeStruct((1, N_CLASS), jnp.float32),
                   jax.ShapeDtypeStruct((N_TOKEN, N_INST), jnp.float32)),
        in_specs=[vmem] * len(args),
        out_specs=(vmem, vmem, vmem),
    )(*args)

    return token_logits, slide_logits, a_out[None]                    # A_out.unsqueeze(0)


if __name__ == "__main__":
    key = jax.random.PRNGKey(0)
    k_param, k_x = jax.random.split(key)
    params = init_params(k_param)
    x = jax.random.normal(k_x, (1, N_INST, D_FEAT), jnp.float32)

    token_logits, slide_logits, attn = attnmil2_forward(params, x)
    jax.block_until_ready((token_logits, slide_logits, attn))

    assert token_logits.shape == (N_TOKEN, N_CLASS)
    assert slide_logits.shape == (1, N_CLASS)
    assert attn.shape == (1, N_TOKEN, N_INST)
    print("KERNEL_OK")
</pallas_src>

<mosaic_0001>
module attributes {stable_mosaic.version = 11 : i64} {
  func.func @_attnmil2_kernel(%arg0: memref<64x64xf32, #tpu.memory_space<vmem>>, %arg1: memref<64x32xf32, #tpu.memory_space<vmem>>, %arg2: memref<32x256xf32, #tpu.memory_space<vmem>>, %arg3: memref<1x256xf32, #tpu.memory_space<vmem>>, %arg4: memref<4x128xf32, #tpu.memory_space<vmem>>, %arg5: memref<4x1xf32, #tpu.memory_space<vmem>>, %arg6: memref<2x4x32xf32, #tpu.memory_space<vmem>>, %arg7: memref<4x2xf32, #tpu.memory_space<vmem>>, %arg8: memref<32x256xf32, #tpu.memory_space<vmem>>, %arg9: memref<1x256xf32, #tpu.memory_space<vmem>>, %arg10: memref<1x128xf32, #tpu.memory_space<vmem>>, %arg11: memref<1x1xf32, #tpu.memory_space<vmem>>, %arg12: memref<32x2xf32, #tpu.memory_space<vmem>>, %arg13: memref<1x2xf32, #tpu.memory_space<vmem>>, %arg14: memref<4x2xf32, #tpu.memory_space<vmem>>, %arg15: memref<1x2xf32, #tpu.memory_space<vmem>>, %arg16: memref<4x64xf32, #tpu.memory_space<vmem>>) attributes {dimension_semantics = [], scalar_prefetch = 0 : i64, scratch_operands = 0 : i64, tpu.core_type = #tpu.core_type<tc>} {
    %c0 = arith.constant 0 : index
    %c0_0 = arith.constant 0 : index
    %0 = vector.load %arg0[%c0, %c0_0] : memref<64x64xf32, #tpu.memory_space<vmem>>, vector<64x64xf32>
    %c0_1 = arith.constant 0 : index
    %c0_2 = arith.constant 0 : index
    %1 = vector.load %arg1[%c0_1, %c0_2] : memref<64x32xf32, #tpu.memory_space<vmem>>, vector<64x32xf32>
    %cst = arith.constant dense<0.000000e+00> : vector<64x32xf32>
    %2 = tpu.matmul %0, %1, %cst {dimension_numbers = #tpu.dot_dimension_numbers<[1], [0], [0], [1], [0, 0, 1, 1], [], []>} : vector<64x64xf32>, vector<64x32xf32>, vector<64x32xf32> -> vector<64x32xf32>
    %cst_3 = arith.constant 0.000000e+00 : f32
    %3 = vector.broadcast %cst_3 : f32 to vector<64x32xf32>
    %4 = arith.maximumf %2, %3 : vector<64x32xf32>
    %c0_4 = arith.constant 0 : index
    %c0_5 = arith.constant 0 : index
    %5 = vector.load %arg2[%c0_4, %c0_5] : memref<32x256xf32, #tpu.memory_space<vmem>>, vector<32x256xf32>
    %cst_6 = arith.constant dense<0.000000e+00> : vector<64x256xf32>
    %6 = tpu.matmul %4, %5, %cst_6 {dimension_numbers = #tpu.dot_dimension_numbers<[1], [0], [0], [1], [0, 0, 1, 1], [], []>} : vector<64x32xf32>, vector<32x256xf32>, vector<64x256xf32> -> vector<64x256xf32>
    %c0_7 = arith.constant 0 : index
    %c0_8 = arith.constant 0 : index
    %7 = vector.load %arg3[%c0_7, %c0_8] : memref<1x256xf32, #tpu.memory_space<vmem>>, vector<1x256xf32>
    %8 = vector.broadcast %7 : vector<1x256xf32> to vector<64x256xf32>
    %9 = arith.addf %6, %8 : vector<64x256xf32>
    %10 = vector.extract_strided_slice %9 {offsets = [0, 0], sizes = [64, 128], strides = [1, 1]} : vector<64x256xf32> to vector<64x128xf32>
    %11 = math.tanh %10 : vector<64x128xf32>
    %12 = vector.extract_strided_slice %9 {offsets = [0, 128], sizes = [64, 128], strides = [1, 1]} : vector<64x256xf32> to vector<64x128xf32>
    %cst_9 = arith.constant 0.000000e+00 : f32
    %13 = vector.broadcast %cst_9 : f32 to vector<64x128xf32>
    %14 = arith.subf %13, %12 : vector<64x128xf32>
    %15 = math.exp %14 : vector<64x128xf32>
    %cst_10 = arith.constant 1.000000e+00 : f32
    %16 = vector.broadcast %cst_10 : f32 to vector<64x128xf32>
    %17 = arith.addf %16, %15 : vector<64x128xf32>
    %cst_11 = arith.constant 1.000000e+00 : f32
    %18 = vector.broadcast %cst_11 : f32 to vector<64x128xf32>
    %19 = arith.divf %18, %17 : vector<64x128xf32>
    %20 = arith.mulf %11, %19 : vector<64x128xf32>
    %c0_12 = arith.constant 0 : index
    %c0_13 = arith.constant 0 : index
    %21 = vector.load %arg4[%c0_12, %c0_13] : memref<4x128xf32, #tpu.memory_space<vmem>>, vector<4x128xf32>
    %cst_14 = arith.constant dense<0.000000e+00> : vector<4x64xf32>
    %22 = tpu.matmul %21, %20, %cst_14 {dimension_numbers = #tpu.dot_dimension_numbers<[1], [1], [0], [0], [0, 0, 1, 0], [], []>} : vector<4x128xf32>, vector<64x128xf32>, vector<4x64xf32> -> vector<4x64xf32>
    %c0_15 = arith.constant 0 : index
    %c0_16 = arith.constant 0 : index
    %23 = vector.load %arg5[%c0_15, %c0_16] : memref<4x1xf32, #tpu.memory_space<vmem>>, vector<4x1xf32>
    %24 = vector.broadcast %23 : vector<4x1xf32> to vector<4x64xf32>
    %25 = arith.addf %22, %24 : vector<4x64xf32>
    %c0_17 = arith.constant 0 : index
    %c0_18 = arith.constant 0 : index
    %26 = vector.load %arg16[%c0_17, %c0_18] : memref<4x64xf32, #tpu.memory_space<vmem>>, vector<4x64xf32>
    tpu.vector_store %arg16[%c0_17, %c0_18], %25 {strides = array<i32>} : memref<4x64xf32, #tpu.memory_space<vmem>>, vector<4x64xf32>,
    %cst_19 = arith.constant dense<0xFF800000> : vector<4xf32>
    %27 = vector.multi_reduction <maximumf>, %25, %cst_19 [1] : vector<4x64xf32> to vector<4xf32>
    %28 = vector.shape_cast %27 : vector<4xf32> to vector<4x1xf32>
    %29 = vector.broadcast %28 : vector<4x1xf32> to vector<4x64xf32>
    %30 = arith.subf %25, %29 : vector<4x64xf32>
    %31 = math.exp %30 : vector<4x64xf32>
    %cst_20 = arith.constant dense<0.000000e+00> : vector<4xf32>
    %32 = vector.multi_reduction <add>, %31, %cst_20 [1] : vector<4x64xf32> to vector<4xf32>
    %33 = vector.shape_cast %32 : vector<4xf32> to vector<4x1xf32>
    %34 = tpu.reciprocal %33 {approx = true} : vector<4x1xf32> -> vector<4x1xf32>
    %35 = vector.broadcast %34 : vector<4x1xf32> to vector<4x64xf32>
    %36 = arith.mulf %31, %35 : vector<4x64xf32>
    %cst_21 = arith.constant dense<0.000000e+00> : vector<4x32xf32>
    %37 = tpu.matmul %36, %4, %cst_21 {dimension_numbers = #tpu.dot_dimension_numbers<[1], [0], [0], [1], [0, 0, 1, 1], [], []>} : vector<4x64xf32>, vector<64x32xf32>, vector<4x32xf32> -> vector<4x32xf32>
    %c0_22 = arith.constant 0 : index
    %c0_23 = arith.constant 0 : index
    %c0_24 = arith.constant 0 : index
    %38 = vector.load %arg6[%c0_22, %c0_23, %c0_24] : memref<2x4x32xf32, #tpu.memory_space<vmem>>, vector<1x4x32xf32>
    %39 = vector.shape_cast %38 : vector<1x4x32xf32> to vector<4x32xf32>
    %40 = arith.mulf %37, %39 : vector<4x32xf32>
    %cst_25 = arith.constant dense<0.000000e+00> : vector<4xf32>
    %41 = vector.multi_reduction <add>, %40, %cst_25 [1] : vector<4x32xf32> to vector<4xf32>
    %42 = vector.shape_cast %41 : vector<4xf32> to vector<4x1xf32>
    %c1 = arith.constant 1 : index
    %c0_26 = arith.constant 0 : index
    %c0_27 = arith.constant 0 : index
    %43 = vector.load %arg6[%c1, %c0_26, %c0_27] : memref<2x4x32xf32, #tpu.memory_space<vmem>>, vector<1x4x32xf32>
    %44 = vector.shape_cast %43 : vector<1x4x32xf32> to vector<4x32xf32>
    %45 = arith.mulf %37, %44 : vector<4x32xf32>
    %cst_28 = arith.constant dense<0.000000e+00> : vector<4xf32>
    %46 = vector.multi_reduction <add>, %45, %cst_28 [1] : vector<4x32xf32> to vector<4xf32>
    %47 = vector.shape_cast %46 : vector<4xf32> to vector<4x1xf32>
    %48 = tpu.concatenate %42, %47 in 1 : vector<4x1xf32>, vector<4x1xf32> -> vector<4x2xf32>
    %c0_29 = arith.constant 0 : index
    %c0_30 = arith.constant 0 : index
    %49 = vector.load %arg7[%c0_29, %c0_30] : memref<4x2xf32, #tpu.memory_space<vmem>>, vector<4x2xf32>
    %50 = arith.addf %48, %49 : vector<4x2xf32>
    %c0_31 = arith.constant 0 : index
    %c0_32 = arith.constant 0 : index
    %51 = vector.load %arg14[%c0_31, %c0_32] : memref<4x2xf32, #tpu.memory_space<vmem>>, vector<4x2xf32>
    tpu.vector_store %arg14[%c0_31, %c0_32], %50 {strides = array<i32>} : memref<4x2xf32, #tpu.memory_space<vmem>>, vector<4x2xf32>,
    %c0_33 = arith.constant 0 : index
    %c0_34 = arith.constant 0 : index
    %52 = vector.load %arg8[%c0_33, %c0_34] : memref<32x256xf32, #tpu.memory_space<vmem>>, vector<32x256xf32>
    %cst_35 = arith.constant dense<0.000000e+00> : vector<4x256xf32>
    %53 = tpu.matmul %37, %52, %cst_35 {dimension_numbers = #tpu.dot_dimension_numbers<[1], [0], [0], [1], [0, 0, 1, 1], [], []>} : vector<4x32xf32>, vector<32x256xf32>, vector<4x256xf32> -> vector<4x256xf32>
    %c0_36 = arith.constant 0 : index
    %c0_37 = arith.constant 0 : index
    %54 = vector.load %arg9[%c0_36, %c0_37] : memref<1x256xf32, #tpu.memory_space<vmem>>, vector<1x256xf32>
    %55 = vector.broadcast %54 : vector<1x256xf32> to vector<4x256xf32>
    %56 = arith.addf %53, %55 : vector<4x256xf32>
    %57 = vector.extract_strided_slice %56 {offsets = [0, 0], sizes = [4, 128], strides = [1, 1]} : vector<4x256xf32> to vector<4x128xf32>
    %58 = math.tanh %57 : vector<4x128xf32>
    %59 = vector.extract_strided_slice %56 {offsets = [0, 128], sizes = [4, 128], strides = [1, 1]} : vector<4x256xf32> to vector<4x128xf32>
    %cst_38 = arith.constant 0.000000e+00 : f32
    %60 = vector.broadcast %cst_38 : f32 to vector<4x128xf32>
    %61 = arith.subf %60, %59 : vector<4x128xf32>
    %62 = math.exp %61 : vector<4x128xf32>
    %cst_39 = arith.constant 1.000000e+00 : f32
    %63 = vector.broadcast %cst_39 : f32 to vector<4x128xf32>
    %64 = arith.addf %63, %62 : vector<4x128xf32>
    %cst_40 = arith.constant 1.000000e+00 : f32
    %65 = vector.broadcast %cst_40 : f32 to vector<4x128xf32>
    %66 = arith.divf %65, %64 : vector<4x128xf32>
    %67 = arith.mulf %58, %66 : vector<4x128xf32>
    %c0_41 = arith.constant 0 : index
    %c0_42 = arith.constant 0 : index
    %68 = vector.load %arg10[%c0_41, %c0_42] : memref<1x128xf32, #tpu.memory_space<vmem>>, vector<1x128xf32>
    %cst_43 = arith.constant dense<0.000000e+00> : vector<1x4xf32>
    %69 = tpu.matmul %68, %67, %cst_43 {dimension_numbers = #tpu.dot_dimension_numbers<[1], [1], [0], [0], [0, 0, 1, 0], [], []>} : vector<1x128xf32>, vector<4x128xf32>, vector<1x4xf32> -> vector<1x4xf32>
    %c0_44 = arith.constant 0 : index
    %c0_45 = arith.constant 0 : index
    %70 = vector.load %arg11[%c0_44, %c0_45] : memref<1x1xf32, #tpu.memory_space<vmem>>, vector<1x1xf32>
    %71 = vector.broadcast %70 : vector<1x1xf32> to vector<1x4xf32>
    %72 = arith.addf %69, %71 : vector<1x4xf32>
    %cst_46 = arith.constant dense<0xFF800000> : vector<1xf32>
    %73 = vector.multi_reduction <maximumf>, %72, %cst_46 [1] : vector<1x4xf32> to vector<1xf32>
    %74 = vector.shape_cast %73 : vector<1xf32> to vector<1x1xf32>
    %75 = vector.broadcast %74 : vector<1x1xf32> to vector<1x4xf32>
    %76 = arith.subf %72, %75 : vector<1x4xf32>
    %77 = math.exp %76 : vector<1x4xf32>
    %cst_47 = arith.constant dense<0.000000e+00> : vector<1xf32>
    %78 = vector.multi_reduction <add>, %77, %cst_47 [1] : vector<1x4xf32> to vector<1xf32>
    %79 = vector.shape_cast %78 : vector<1xf32> to vector<1x1xf32>
    %80 = tpu.reciprocal %79 {approx = true} : vector<1x1xf32> -> vector<1x1xf32>
    %81 = vector.broadcast %80 : vector<1x1xf32> to vector<1x4xf32>
    %82 = arith.mulf %77, %81 : vector<1x4xf32>
    %cst_48 = arith.constant dense<0.000000e+00> : vector<1x32xf32>
    %83 = tpu.matmul %82, %37, %cst_48 {dimension_numbers = #tpu.dot_dimension_numbers<[1], [0], [0], [1], [0, 0, 1, 1], [], []>} : vector<1x4xf32>, vector<4x32xf32>, vector<1x32xf32> -> vector<1x32xf32>
    %c0_49 = arith.constant 0 : index
    %c0_50 = arith.constant 0 : index
    %84 = vector.load %arg12[%c0_49, %c0_50] : memref<32x2xf32, #tpu.memory_space<vmem>>, vector<32x2xf32>
    %cst_51 = arith.constant dense<0.000000e+00> : vector<1x2xf32>
    %85 = tpu.matmul %83, %84, %cst_51 {dimension_numbers = #tpu.dot_dimension_numbers<[1], [0], [0], [1], [0, 0, 1, 1], [], []>} : vector<1x32xf32>, vector<32x2xf32>, vector<1x2xf32> -> vector<1x2xf32>
    %c0_52 = arith.constant 0 : index
    %c0_53 = arith.constant 0 : index
    %86 = vector.load %arg13[%c0_52, %c0_53] : memref<1x2xf32, #tpu.memory_space<vmem>>, vector<1x2xf32>
    %87 = arith.addf %85, %86 : vector<1x2xf32>
    %c0_54 = arith.constant 0 : index
    %c0_55 = arith.constant 0 : index
    %88 = vector.load %arg15[%c0_54, %c0_55] : memref<1x2xf32, #tpu.memory_space<vmem>>, vector<1x2xf32>
    tpu.vector_store %arg15[%c0_54, %c0_55], %87 {strides = array<i32>} : memref<1x2xf32, #tpu.memory_space<vmem>>, vector<1x2xf32>,
    return
  }
}

</mosaic_0001>

<bundles_post_ra>
// kernel: tpu_custom_call.1
= control target key start
LH: loop header
LB: loop body
LE: loop exit
PB: predicated region body
PF: predicated region fallthrough
CT: control target
= control target key end

     0   :  { %s1348_s0 = inlined_call_operand.vmem [shape: f32[64,64], index: 0, kind: input, shape index: {}]   ;;  %s1349_s1 = inlined_call_operand.vmem [shape: f32[64,32], index: 1, kind: input, shape index: {}]   ;;  %s1350_s2 = inlined_call_operand.hbm [shape: f32[32,256], index: 2, kind: input, shape index: {}]   ;;  %s1351_s3 = inlined_call_operand.vmem [shape: f32[1,256], index: 3, kind: input, shape index: {}]   ;;  %s1352_s4 = inlined_call_operand.vmem [shape: f32[4,128], index: 4, kind: input, shape index: {}]   ;;  %s1353_s5 = inlined_call_operand.vmem [shape: f32[4,1], index: 5, kind: input, shape index: {}]   ;;  %s1354_s6 = inlined_call_operand.vmem [shape: f32[2,4,32], index: 6, kind: input, shape index: {}]   ;;  %s1355_s7 = inlined_call_operand.vmem [shape: f32[4,2], index: 7, kind: input, shape index: {}]   ;;  %s1356_s8 = inlined_call_operand.hbm [shape: f32[32,256], index: 8, kind: input, shape index: {}]   ;;  %s1357_s9 = inlined_call_operand.vmem [shape: f32[1,256], index: 9, kind: input, shape index: {}]   ;;  %s1358_s10 = inlined_call_operand.vmem [shape: f32[1,128], index: 10, kind: input, shape index: {}]   ;;  %s1359_s11 = inlined_call_operand.<no memory space> [shape: f32[1,1], index: 11, kind: input, shape index: {}]   ;;  %s1360_s12 = inlined_call_operand.vmem [shape: f32[32,2], index: 12, kind: input, shape index: {}]   ;;  %s1361_s13 = inlined_call_operand.vmem [shape: f32[1,2], index: 13, kind: input, shape index: {}]   ;;  %s1362_s14 = inlined_call_operand.vmem [shape: f32[4,2], index: 14, kind: output, shape index: {0}]   ;;  %s1363_s15 = inlined_call_operand.hbm [shape: f32[1,2], index: 15, kind: output, shape index: {1}]   ;;  %s1364_s16 = inlined_call_operand.hbm [shape: f32[4,64], index: 16, kind: output, shape index: {2}]  }
   0x1   :  { %1366 = sst [smem:[#allocation15_spill]] %s1348_s0  ;;  %v22_v0 = vstv %s1359_s11 }
   0x2   :  { %23 = vst [vmem:[#allocation2] sm:$0x1] %v22_v0 }
   0x3   :  { %24 = vsyncpa [#allocation4], 0 }
   0x4   :  { %25 = vsyncpa [#allocation7], 0 }
   0x5   :  { %26 = vsyncpa [#allocation5], 0 }
   0x6   :  { %27 = vsyncpa [#allocation10], 0  ;;  %s36_s25 = sshll.u32 %s1350_s2, 4  ;;  %s965_s26 = smov [#allocation3]   ;;  %s37_s25 = int_to_ptr.hbm [resolvable:$true] %s36_s25 }
   0x7   :  { %s38_s27 = sshll.u32 %s965_s26, 4  ;;  %s59_s30 = sshll.u32 %s1356_s8, 4  ;;  %s39_s27 = int_to_ptr.vmem [resolvable:$true] %s38_s27  ;;  %s60_s30 = int_to_ptr.hbm [resolvable:$true] %s59_s30 }
   0x8   :  { %s966_s0 = smov 256   ;;  %s967_s17 = smov 16  }
   0x9   :  { %44 = dma.hbm_to_vmem [thread:$0]  %s37_s25, 1024, %s39_s27, [#allocation4], %s966_s0, %s966_s0, %s967_s17  }
   0xa   :  { %s968_s11 = smov [#allocation6]  }
   0xb   :  { %s61_s18 = sshll.u32 %s968_s11, 4  ;;  %s62_s18 = int_to_ptr.vmem [resolvable:$true] %s61_s18 }
   0xc   :  { %67 = dma.hbm_to_vmem [thread:$0]  %s60_s30, 1024, %s62_s18, [#allocation7], %s966_s0, %s966_s0, %s967_s17  }
   0xd   :  { %957 = dma.done.wait [#allocation4], 1024  }
   0xe   :  { %958 = vsyncadd [#allocation4], 4294966272 }
   0xf   :  { %959 = dma.done.wait [#allocation7], 1024  }
  0x10   :  { %960 = vsyncadd [#allocation7], 4294966272  ;;  %v101_v1 = vld [vmem:[%s1349_s1 + $0x38] sm:$0xff]  ;;  %v100_v2 = vld [vmem:[%s1349_s1 + $0x30] sm:$0xff]  ;;  %s1367_s2 = sld [smem:[#allocation15_spill]]  ;;  %vm102_vm0 = vcmask 523264  }
  0x11   :  { %135 = vmatpush.msra.mxu0 %v101_v1  ;;  %v99_v3 = vld [vmem:[%s1349_s1 + $0x28] sm:$0xff]  ;;  %v98_v4 = vld [vmem:[%s1349_s1 + $0x20] sm:$0xff]  ;;  %v97_v5 = vld [vmem:[%s1349_s1 + $0x18] sm:$0xff]  ;;  %vm190_vm1 = vcmask 261120   ;;  %s970_s17 = smov [#allocation9]   ;;  %s741_s18 = sshll.u32 %s1364_s16, 4  ;;  %s742_s18 = int_to_ptr.hbm [resolvable:$true] %s741_s18 }
  0x12   :  { %v96_v6 = vld [vmem:[%s1349_s1 + $0x10] sm:$0xff]  ;;  %v95_v7 = vld [vmem:[%s1349_s1 + $0x8] sm:$0xff]  ;;  %v94_v8 = vld [vmem:[%s1349_s1] sm:$0xff]  ;;  %s730_s19 = sshll.u32 %s1363_s15, 4  ;;  %s731_s19 = int_to_ptr.hbm [resolvable:$true] %s730_s19 }
  0x13   :  { %136 = vmatpush.msra.mxu0 %v100_v2  ;;  %v182_v13 = vld [vmem:[#allocation3 + $0x30] sm:$0xff]  ;;  %v183_v14 = vld [vmem:[#allocation3 + $0x38] sm:$0xff]  ;;  %v180_v15 = vld [vmem:[#allocation3 + $0x20] sm:$0xff] }
  0x14   :  { %227 = vmatpush.msra.mxu1 %v182_v13  ;;  %268 = vmatpush.msra.mxu2 %v183_v14  ;;  %v181_v16 = vld [vmem:[#allocation3 + $0x28] sm:$0xff]  ;;  %v178_v21 = vld [vmem:[#allocation3 + $0x10] sm:$0xff]  ;;  %v179_v22 = vld [vmem:[#allocation3 + $0x18] sm:$0xff] }
  0x15   :  { %137 = vmatpush.msra.mxu0 %v99_v3  ;;  %v176_v23 = vld [vmem:[#allocation3] sm:$0xff]  ;;  %v177_v24 = vld [vmem:[#allocation3 + $0x8] sm:$0xff] }
  0x16   :  { %v86_v9 = vld [vmem:[%s1367_s2] sm:$0xff]  ;;  %v87_v10 = vld [vmem:[%s1367_s2 + $0x8] sm:$0xff]  ;;  %v88_v11 = vld [vmem:[%s1367_s2 + $0x10] sm:$0xff]  ;;  %228 = vmatpush.msra.mxu1 %v180_v15  ;;  %269 = vmatpush.msra.mxu2 %v181_v16 }
  0x17   :  { %138 = vmatpush.msra.mxu0 %v98_v4  ;;  %v89_v12 = vld [vmem:[%s1367_s2 + $0x18] sm:$0xff]  ;;  %v90_v17 = vld [vmem:[%s1367_s2 + $0x20] sm:$0xff]  ;;  %v91_v18 = vld [vmem:[%s1367_s2 + $0x28] sm:$0xff] }
  0x18   :  { %v92_v19 = vld [vmem:[%s1367_s2 + $0x30] sm:$0xff]  ;;  %v93_v20 = vld [vmem:[%s1367_s2 + $0x38] sm:$0xff]  ;;  %229 = vmatpush.msra.mxu1 %v178_v21  ;;  %270 = vmatpush.msra.mxu2 %v179_v22  ;;  %v184_v41 = vld [vmem:[%s1351_s3] sm:$0x3]  ;;  %s739_s3 = sshll.u32 %s970_s17, 4  ;;  %s740_s3 = int_to_ptr.vmem [resolvable:$true] %s739_s3 }
  0x19   :  { %139 = vmatpush.msra.mxu0 %v97_v5  ;;  %v1173_v42 = vperm.slane %v184_v41, 1  ;;  %v1177_v56 = vperm.slane %v184_v41, 0 }
  0x1a   :  { %230 = vmatpush.msra.mxu1 %v176_v23  ;;  %271 = vmatpush.msra.mxu2 %v177_v24 }
  0x1b   :  { %140 = vmatpush.msra.mxu0 %v96_v6 }
  0x1d   :  { %141 = vmatpush.msra.mxu0 %v95_v7 }
  0x1f   :  { %142 = vmatpush.msra.mxu0 %v94_v8 }
  0x20   :  { %759 = vmatmul.msk.f32.vlgmr.msra.gmra.mxu0 %vm102_vm0, %v86_v9 }
  0x28   :  { %760 = vmatmul.msk.f32.gmra.mxu0 %vm102_vm0, %v87_v10 }
  0x30   :  { %761 = vmatmul.msk.f32.gmra.mxu0 %vm102_vm0, %v88_v11 }
  0x38   :  { %762 = vmatmul.msk.f32.gmra.mxu0 %vm102_vm0, %v89_v12 }
  0x40   :  { %763 = vmatmul.msk.f32.gmra.mxu0 %vm102_vm0, %v90_v17 }
  0x48   :  { %764 = vmatmul.msk.f32.gmra.mxu0 %vm102_vm0, %v91_v18 }
  0x50   :  { %765 = vmatmul.msk.f32.gmra.mxu0 %vm102_vm0, %v92_v19 }
  0x58   :  { %766 = vmatmul.msk.f32.gmra.mxu0 %vm102_vm0, %v93_v20 }
  0x9d   :  { %v144_v25 = vpop.f32.mrf.mxu0 }
  0x9e   :  { %v1122_v26 = vmax.f32 %v144_v25, 0.0 }
  0xa0   :  { %767 = vmatmul.msk.f32.vlgmr.msra.gmra.mxu1 %vm190_vm1, %v1122_v26  ;;  %775 = vmatmul.msk.f32.vlgmr.msra.gmra.mxu2 %vm190_vm1, %v1122_v26 }
  0xa5   :  { %v147_v27 = vpop.f32.mrf.mxu0 }
  0xa6   :  { %v1128_v28 = vmax.f32 %v147_v27, 0.0 }
  0xa8   :  { %768 = vmatmul.msk.f32.gmra.mxu1 %vm190_vm1, %v1128_v28  ;;  %776 = vmatmul.msk.f32.gmra.mxu2 %vm190_vm1, %v1128_v28 }
  0xad   :  { %v150_v29 = vpop.f32.mrf.mxu0 }
  0xae   :  { %v1134_v30 = vmax.f32 %v150_v29, 0.0 }
  0xb0   :  { %769 = vmatmul.msk.f32.gmra.mxu1 %vm190_vm1, %v1134_v30  ;;  %777 = vmatmul.msk.f32.gmra.mxu2 %vm190_vm1, %v1134_v30 }
  0xb5   :  { %v153_v31 = vpop.f32.mrf.mxu0 }
  0xb6   :  { %v1140_v32 = vmax.f32 %v153_v31, 0.0 }
  0xb8   :  { %770 = vmatmul.msk.f32.gmra.mxu1 %vm190_vm1, %v1140_v32  ;;  %778 = vmatmul.msk.f32.gmra.mxu2 %vm190_vm1, %v1140_v32 }
  0xbd   :  { %v156_v33 = vpop.f32.mrf.mxu0 }
  0xbe   :  { %v1146_v34 = vmax.f32 %v156_v33, 0.0 }
  0xc0   :  { %771 = vmatmul.msk.f32.gmra.mxu1 %vm190_vm1, %v1146_v34  ;;  %779 = vmatmul.msk.f32.gmra.mxu2 %vm190_vm1, %v1146_v34 }
  0xc5   :  { %v159_v35 = vpop.f32.mrf.mxu0 }
  0xc6   :  { %v1152_v36 = vmax.f32 %v159_v35, 0.0 }
  0xc8   :  { %772 = vmatmul.msk.f32.gmra.mxu1 %vm190_vm1, %v1152_v36  ;;  %780 = vmatmul.msk.f32.gmra.mxu2 %vm190_vm1, %v1152_v36 }
  0xcd   :  { %v162_v37 = vpop.f32.mrf.mxu0 }
  0xce   :  { %v1158_v38 = vmax.f32 %v162_v37, 0.0 }
  0xd0   :  { %773 = vmatmul.msk.f32.gmra.mxu1 %vm190_vm1, %v1158_v38  ;;  %781 = vmatmul.msk.f32.gmra.mxu2 %vm190_vm1, %v1158_v38 }
  0xd5   :  { %v165_v39 = vpop.f32.mrf.mxu0 }
  0xd6   :  { %v1164_v40 = vmax.f32 %v165_v39, 0.0 }
  0xd8   :  { %774 = vmatmul.msk.f32.gmra.mxu1 %vm190_vm1, %v1164_v40  ;;  %782 = vmatmul.msk.f32.gmra.mxu2 %vm190_vm1, %v1164_v40 }
 0x11d   :  { %v232_v46 = vpop.f32.mrf.mxu1 }
 0x11e   :  { %v233_v60 = vadd.f32 %v232_v46, %v1177_v56 }
 0x123   :  { %v273_v43 = vpop.f32.mrf.mxu2 }
 0x124   :  { %v274_v44 = vadd.f32 %v273_v43, %v1173_v42 }
 0x125   :  { %v235_v54 = vpop.f32.mrf.mxu1 }
 0x126   :  { %v305_v45 = vsub.f32 0.0, %v274_v44  ;;  %v236_v6 = vadd.f32 %v235_v54, %v1177_v56 }
 0x128   :  { %v313_v47 = vmul.f32 1.442695, %v305_v45 }
 0x12a   :  { %799 = vpow2.f32 %v313_v47 }
 0x12b   :  { %v276_v48 = vpop.f32.mrf.mxu2 }
 0x12c   :  { %v277_v49 = vadd.f32 %v276_v48, %v1173_v42 }
 0x12d   :  { %v1180_v62 = vpop.f32.mrf.mxu1 }
 0x12e   :  { %v306_v50 = vsub.f32 0.0, %v277_v49 }
 0x130   :  { %v800_v51 = vpop.eup %799  ;;  %v315_v52 = vmul.f32 1.442695, %v306_v50 }
 0x131   :  { %v329_v53 = vadd.f32 1.0, %v800_v51 }
 0x132   :  { %801 = vpow2.f32 %v315_v52 }
 0x133   :  { %803 = vrcp.f32 %v329_v53  ;;  %v279_v55 = vpop.f32.mrf.mxu2  ;;  %v348_v2 = vand.u32 2147483648, %v329_v53  ;;  %v346_v3 = vand.u32 2147483647, %v329_v53  ;;  %vm342_vm3 = vweird.f32 %v329_v53 }
 0x134   :  { %v280_v44 = vadd.f32 %v279_v55, %v1173_v42 }
 0x135   :  { %v349_v9 = vor.u32 1.1754944e-38, %v348_v2  ;;  %vm347_vm5 = vcmp.eq.f32.partialorder %v346_v3, 8.507059e+37  ;;  %v1183_v14 = vpop.f32.mrf.mxu1 }
 0x136   :  { %v307_v49 = vsub.f32 0.0, %v280_v44 }
 0x138   :  { %v802_v57 = vpop.eup %801 }
 0x139   :  { %v804_v58 = vpop.eup %803  ;;  %v330_v59 = vadd.f32 1.0, %v802_v57  ;;  %v317_v57 = vmul.f32 1.442695, %v307_v49 }
 0x13a   :  { %v338_v61 = vmul.f32 %v804_v58, %v329_v53  ;;  %vm343_vm2 = vweird.f32 %v804_v58 }
 0x13b   :  { %805 = vrcp.f32 %v330_v59  ;;  %v282_v63 = vpop.f32.mrf.mxu2  ;;  %vm344_vm4 = vmor %vm342_vm3, %vm343_vm2  ;;  %v363_v17 = vand.u32 2147483648, %v330_v59  ;;  %v361_v18 = vand.u32 2147483647, %v330_v59  ;;  %vm357_vm7 = vweird.f32 %v330_v59 }
 0x13c   :  { %v339_v0 = vsub.f32 1.0, %v338_v61  ;;  %807 = vtanh.f32 %v233_v60  ;;  %v283_v35 = vadd.f32 %v282_v63, %v1173_v42 }
 0x13d   :  { %809 = vtanh.f32 %v236_v6  ;;  %v364_v21 = vor.u32 1.1754944e-38, %v363_v17  ;;  %vm362_vm9 = vcmp.eq.f32.partialorder %v361_v18, 8.507059e+37  ;;  %v1190_v29 = vpop.f32.mrf.mxu1 }
 0x13e   :  { %v340_v1 = vmul.f32 %v804_v58, %v339_v0  ;;  %v308_v45 = vsub.f32 0.0, %v283_v35 }
 0x140   :  { %v341_v4 = vadd.f32 %v804_v58, %v340_v1  ;;  %v319_v50 = vmul.f32 1.442695, %v308_v45 }
 0x141   :  { %v806_v5 = vpop.eup %805 }
 0x142   :  { %v353_v7 = vmul.f32 %v806_v5, %v330_v59  ;;  %v345_v8 = vsel %vm344_vm4, %v804_v58, %v341_v4  ;;  %v808_v11 = vpop.eup %807  ;;  %vm358_vm6 = vweird.f32 %v806_v5 }
 0x143   :  { %v285_v10 = vpop.f32.mrf.mxu2  ;;  %v350_v13 = vsel %vm347_vm5, %v349_v9, %v345_v8  ;;  %vm359_vm8 = vmor %vm357_vm7, %vm358_vm6  ;;  %v810_v23 = vpop.eup %809 }
 0x144   :  { %v354_v12 = vsub.f32 1.0, %v353_v7  ;;  %v1185_v15 = vmul.f32 %v808_v11, %v350_v13  ;;  %v286_v31 = vadd.f32 %v285_v10, %v1173_v42 }
 0x145   :  { %v247_v51 = vpop.f32.mrf.mxu1 }
 0x146   :  { %v355_v16 = vmul.f32 %v806_v5, %v354_v12  ;;  %v309_v37 = vsub.f32 0.0, %v286_v31  ;;  %v248_v44 = vadd.f32 %v247_v51, %v1177_v56 }
 0x148   :  { %v356_v19 = vadd.f32 %v806_v5, %v355_v16  ;;  %v321_v47 = vmul.f32 1.442695, %v309_v37 }
 0x14a   :  { %v360_v20 = vsel %vm359_vm8, %v806_v5, %v356_v19 }
 0x14b   :  { %v288_v22 = vpop.f32.mrf.mxu2  ;;  %v365_v25 = vsel %vm362_vm9, %v364_v21, %v360_v20 }
 0x14c   :  { %v289_v24 = vadd.f32 %v288_v22, %v1173_v42  ;;  %v1188_v27 = vmul.f32 %v810_v23, %v365_v25 }
 0x14d   :  { %v250_v1 = vpop.f32.mrf.mxu1 }
 0x14e   :  { %v310_v33 = vsub.f32 0.0, %v289_v24  ;;  %v251_v24 = vadd.f32 %v250_v1, %v1177_v56  ;;  %v245_v1 = vadd.f32 %v1190_v29, %v1177_v56 }
 0x150   :  { %v323_v39 = vmul.f32 1.442695, %v310_v33 }
 0x152   :  { %811 = vpow2.f32 %v323_v39 }
 0x153   :  { %v291_v41 = vpop.f32.mrf.mxu2 }
 0x154   :  { %v292_v43 = vadd.f32 %v291_v41, %v1173_v42 }
 0x155   :  { %v253_v10 = vpop.f32.mrf.mxu1 }
 0x156   :  { %v311_v46 = vsub.f32 0.0, %v292_v43  ;;  %v254_v17 = vadd.f32 %v253_v10, %v1177_v56 }
 0x158   :  { %v325_v48 = vmul.f32 1.442695, %v311_v46  ;;  %v812_v54 = vpop.eup %811 }
 0x159   :  { %v1197_v60 = vadd.f32 1.0, %v812_v54 }
 0x15a   :  { %813 = vpow2.f32 %v325_v48 }
 0x15b   :  { %815 = vpow2.f32 %v321_v47  ;;  %v294_v52 = vpop.f32.mrf.mxu2  ;;  %vm417_vm5 = vweird.f32 %v1197_v60 }
 0x15c   :  { %v295_v53 = vadd.f32 %v294_v52, %v1173_v42  ;;  %817 = vpow2.f32 %v319_v50 }
 0x15d   :  { %819 = vpow2.f32 %v317_v57 }
 0x15e   :  { %v312_v58 = vsub.f32 0.0, %v295_v53 }
 0x160   :  { %v814_v59 = vpop.eup %813  ;;  %v327_v55 = vmul.f32 1.442695, %v312_v58 }
 0x161   :  { %v816_v61 = vpop.eup %815  ;;  %v1199_v63 = vadd.f32 1.0, %v814_v59 }
 0x162   :  { %821 = vpow2.f32 %v327_v55  ;;  %v818_v0 = vpop.eup %817  ;;  %v1202_v2 = vadd.f32 1.0, %v816_v61  ;;  %v423_v61 = vand.u32 2147483648, %v1197_v60 }
 0x163   :  { %823 = vrcp.f32 %v1199_v63  ;;  %v1205_v42 = vadd.f32 1.0, %v818_v0  ;;  %v820_v3 = vpop.eup %819  ;;  %vm432_vm12 = vweird.f32 %v1199_v63  ;;  %v438_v45 = vand.u32 2147483648, %v1199_v63 }
 0x164   :  { %825 = vrcp.f32 %v1197_v60  ;;  %v1210_v8 = vadd.f32 1.0, %v820_v3  ;;  %v436_v49 = vand.u32 2147483647, %v1199_v63  ;;  %v421_v0 = vand.u32 2147483647, %v1197_v60 }
 0x165   :  { %827 = vrcp.f32 %v1202_v2  ;;  %v439_v55 = vor.u32 1.1754944e-38, %v438_v45  ;;  %v424_v10 = vor.u32 1.1754944e-38, %v423_v61  ;;  %vm402_vm9 = vweird.f32 %v1202_v2  ;;  %v549_v61 = vld [vmem:[#allocation6 + $0x18] sm:$0xff] }
 0x166   :  { %829 = vrcp.f32 %v1205_v42  ;;  %vm437_vm4 = vcmp.eq.f32.partialorder %v436_v49, 8.507059e+37  ;;  %vm422_vm8 = vcmp.eq.f32.partialorder %v421_v0, 8.507059e+37 }
 0x168   :  { %v822_v4 = vpop.eup %821 }
 0x169   :  { %v824_v5 = vpop.eup %823  ;;  %v336_v6 = vadd.f32 1.0, %v822_v4 }
 0x16a   :  { %v1208_v7 = vpop.eup %825  ;;  %v428_v9 = vmul.f32 %v824_v5, %v1199_v63  ;;  %vm433_vm10 = vweird.f32 %v824_v5 }
 0x16b   :  { %831 = vrcp.f32 %v336_v6  ;;  %v413_v11 = vmul.f32 %v1208_v7, %v1197_v60  ;;  %v1216_v12 = vpop.eup %827  ;;  %v453_v33 = vand.u32 2147483648, %v336_v6  ;;  %v451_v41 = vand.u32 2147483647, %v336_v6  ;;  %vm1235_vm14 = vmor %vm432_vm12, %vm433_vm10 }
 0x16c   :  { %833 = vrcp.f32 %v1210_v8  ;;  %v429_v13 = vsub.f32 1.0, %v428_v9  ;;  %v1219_v16 = vpop.eup %829  ;;  %v398_v20 = vmul.f32 %v1216_v12, %v1202_v2  ;;  %vm447_vm13 = vweird.f32 %v336_v6 }
 0x16d   :  { %v414_v19 = vsub.f32 1.0, %v413_v11  ;;  %835 = vtanh.f32 %v254_v17  ;;  %v383_v31 = vmul.f32 %v1219_v16, %v1205_v42  ;;  %v454_v50 = vor.u32 1.1754944e-38, %v453_v33 }
 0x16e   :  { %v430_v22 = vmul.f32 %v824_v5, %v429_v13  ;;  %v399_v37 = vsub.f32 1.0, %v398_v20  ;;  %837 = vtanh.f32 %v251_v24  ;;  %vm418_vm2 = vweird.f32 %v1208_v7 }
 0x16f   :  { %v415_v35 = vmul.f32 %v1208_v7, %v414_v19  ;;  %v384_v52 = vsub.f32 1.0, %v383_v31  ;;  %vm452_vm3 = vcmp.eq.f32.partialorder %v451_v41, 8.507059e+37  ;;  %839 = vtanh.f32 %v248_v44  ;;  %vm1252_vm6 = vmor %vm417_vm5, %vm418_vm2 }
 0x170   :  { %v431_v43 = vadd.f32 %v824_v5, %v430_v22  ;;  %v400_v51 = vmul.f32 %v1216_v12, %v399_v37  ;;  %vm403_vm7 = vweird.f32 %v1216_v12  ;;  %v408_v11 = vand.u32 2147483648, %v1202_v2 }
 0x171   :  { %v832_v18 = vpop.eup %831  ;;  %v416_v58 = vadd.f32 %v1208_v7, %v415_v35  ;;  %v385_v29 = vmul.f32 %v1219_v16, %v384_v52  ;;  %v406_v17 = vand.u32 2147483647, %v1202_v2  ;;  %841 = vtanh.f32 %v245_v1  ;;  %vm1267_vm10 = vmor %vm402_vm9, %vm403_vm7 }
 0x172   :  { %v443_v21 = vmul.f32 %v832_v18, %v336_v6  ;;  %v1224_v23 = vpop.eup %833  ;;  %vm448_vm11 = vweird.f32 %v832_v18  ;;  %v435_v57 = vsel %vm1235_vm14, %v824_v5, %v431_v43  ;;  %v401_v60 = vadd.f32 %v1216_v12, %v400_v51 }
 0x173   :  { %v368_v46 = vmul.f32 %v1224_v23, %v1210_v8  ;;  %vm449_vm15 = vmor %vm447_vm13, %vm448_vm11  ;;  %v836_v53 = vpop.eup %835  ;;  %v440_v3 = vsel %vm437_vm4, %v439_v55, %v435_v57  ;;  %v420_v9 = vsel %vm1252_vm6, %v1208_v7, %v416_v58  ;;  %vm388_vm11 = vweird.f32 %v1219_v16  ;;  %v546_v58 = vld [vmem:[#allocation6] sm:$0xff]  ;;  %v551_v55 = vld [vmem:[#allocation6 + $0x28] sm:$0xff] }
 0x174   :  { %v444_v25 = vsub.f32 1.0, %v443_v21  ;;  %v838_v6 = vpop.eup %837  ;;  %v425_v7 = vsel %vm422_vm8, %v424_v10, %v420_v9  ;;  %v405_v20 = vsel %vm1267_vm10, %v1216_v12, %v401_v60  ;;  %v386_v21 = vadd.f32 %v1219_v16, %v385_v29  ;;  %v625_v29 = vld [vmem:[#allocation2] sm:$0x1] }
 0x175   :  { %v369_v5 = vsub.f32 1.0, %v368_v46  ;;  %v463_v13 = vmul.f32 %v838_v6, %v440_v3  ;;  %v840_v22 = vpop.eup %839  ;;  %v409_v24 = vor.u32 1.1754944e-38, %v408_v11  ;;  %vm407_vm12 = vcmp.eq.f32.partialorder %v406_v17, 8.507059e+37  ;;  %v554_v3 = vld [vmem:[%s1357_s9] sm:$0x3] }
 0x176   :  { %v445_v39 = vmul.f32 %v832_v18, %v444_v25  ;;  %v462_v25 = vmul.f32 %v840_v22, %v425_v7  ;;  %vm387_vm13 = vweird.f32 %v1205_v42  ;;  %v391_v31 = vand.u32 2147483647, %v1205_v42 }
 0x177   :  { %v370_v2 = vmul.f32 %v1224_v23, %v369_v5  ;;  %v239_v33 = vadd.f32 %v1180_v62, %v1177_v56  ;;  %v410_v12 = vsel %vm407_vm12, %v409_v24, %v405_v20  ;;  %vm389_vm14 = vmor %vm387_vm13, %vm388_vm11  ;;  %v378_v43 = vand.u32 2147483648, %v1210_v8 }
 0x178   :  { %v446_v47 = vadd.f32 %v832_v18, %v445_v39  ;;  %v390_v35 = vsel %vm389_vm14, %v1219_v16, %v386_v21  ;;  %v842_v39 = vpop.eup %841  ;;  %vm392_vm2 = vcmp.eq.f32.partialorder %v391_v31, 8.507059e+37  ;;  %v466_v16 = vld [vmem:[%s1353_s5] sm:$0xf]  ;;  %vm492_vm6 = vcmask 519168  }
 0x179   :  { %v371_v37 = vadd.f32 %v1224_v23, %v370_v2  ;;  %v461_v44 = vmul.f32 %v842_v39, %v410_v12  ;;  %v379_v46 = vor.u32 1.1754944e-38, %v378_v43  ;;  %vm668_vm7 = vcmask 1043456   ;;  %v624_v12 = vld [vmem:[%s1358_s10] sm:$0x1] }
 0x17a   :  { %v450_v54 = vsel %vm449_vm15, %v832_v18, %v446_v47  ;;  %v242_v18 = vadd.f32 %v1183_v14, %v1177_v56  ;;  %v393_v14 = vand.u32 2147483648, %v1205_v42  ;;  %vm373_vm15 = vweird.f32 %v1224_v23 }
 0x17b   :  { %v455_v59 = vsel %vm452_vm3, %v454_v50, %v450_v54  ;;  %vm372_vm3 = vweird.f32 %v1210_v8  ;;  %v376_v56 = vand.u32 2147483647, %v1210_v8  ;;  %v969_v47 = vmov 0  }
 0x17c   :  { %v464_v63 = vmul.f32 %v836_v53, %v455_v59  ;;  %843 = vtanh.f32 %v242_v18  ;;  %v394_v41 = vor.u32 1.1754944e-38, %v393_v14  ;;  %vm374_vm4 = vmor %vm372_vm3, %vm373_vm15  ;;  %797 = vset.pattern.permute.xlu0 %v969_v47  ;;  %798 = vset.pattern.permute.xlu1 %v969_v47  ;;  %v553_v59 = vld [vmem:[#allocation6 + $0x38] sm:$0xff]  ;;  %v557_v4 = vperm.slane %v554_v3, 1 }
 0x17d   :  { %845 = vtanh.f32 %v239_v33  ;;  %v375_v42 = vsel %vm374_vm4, %v1224_v23, %v371_v37  ;;  %vm377_vm5 = vcmp.eq.f32.partialorder %v376_v56, 8.507059e+37  ;;  %469 = vperm.xlu0 %797, %v466_v16   ;;  %v465_v23 = vld [vmem:[%s1352_s4] sm:$0xf]  ;;  %vm652_vm11 = vcmask 24576  }
 0x17e   :  { %480 = vmatpush.xpose.msra.mxu3 %v464_v63  ;;  %v395_v62 = vsel %vm392_vm2, %v394_v41, %v390_v35  ;;  %v380_v49 = vsel %vm377_vm5, %v379_v46, %v375_v42  ;;  %v547_v63 = vld [vmem:[#allocation6 + $0x8] sm:$0xff]  ;;  %vm530_vm12 = vcmask 257024   ;;  %vm664_vm13 = vcmask 31744  }
 0x17f   :  { %vm540_vm14 = vcmask 7168   ;;  %vm544_vm15 = vcmask 11264  }
 0x182   :  { %481 = vmatpush.xpose.msra.mxu3 %v463_v13  ;;  %v844_v45 = vpop.eup %843  ;;  %v556_v13 = vperm.slane %v554_v3, 0 }
 0x183   :  { %v460_v48 = vmul.f32 %v844_v45, %v395_v62  ;;  %v846_v8 = vpop.eup %845  ;;  %v528_v45 = vld [vmem:[%s1354_s6] sm:$0xf] }
 0x184   :  { %v459_v50 = vmul.f32 %v846_v8, %v380_v49 }
 0x186   :  { %482 = vmatpush.xpose.msra.mxu3 %v462_v25 }
 0x18a   :  { %483 = vmatpush.xpose.msra.mxu3 %v461_v44 }
 0x18e   :  { %484 = vmatpush.xpose.msra.mxu3 %v460_v48  ;;  %v784_v48 = vld [vmem:[%s1354_s6 + $0x4] sm:$0xf] }
 0x192   :  { %485 = vmatpush.xpose.msra.mxu3 %v459_v50  ;;  %v694_v50 = vld [vmem:[%s1360_s12 + $0x18] sm:$0xff] }
 0x196   :  { %486 = vmatpush.xpose.msra.mxu3 %v1188_v27 }
 0x19a   :  { %487 = vmatpush.xpose.msra.mxu3 %v1185_v15 }
 0x19d   :  { %488 = vmatmul.f32.vlgmr.msra.gmra.mxu3 %v465_v23  ;;  %v693_v23 = vld [vmem:[%s1360_s12 + $0x10] sm:$0xff] }
 0x19e   :  { %516 = vmatpush.msrb.mxu3 %v1164_v40 }
 0x1a0   :  { %517 = vmatpush.msrb.mxu3 %v1158_v38 }
 0x1a2   :  { %518 = vmatpush.msrb.mxu3 %v1152_v36 }
 0x1a4   :  { %519 = vmatpush.msrb.mxu3 %v1146_v34 }
 0x1a6   :  { %520 = vmatpush.msrb.mxu3 %v1140_v32  ;;  %v552_v32 = vld [vmem:[#allocation6 + $0x30] sm:$0xff] }
 0x1a8   :  { %521 = vmatpush.msrb.mxu3 %v1134_v30  ;;  %v550_v30 = vld [vmem:[#allocation6 + $0x20] sm:$0xff] }
 0x1aa   :  { %522 = vmatpush.msrb.mxu3 %v1128_v28  ;;  %v548_v28 = vld [vmem:[#allocation6 + $0x10] sm:$0xff] }
 0x1ac   :  { %523 = vmatpush.msrb.mxu3 %v1122_v26 }
 0x1ae   :  { %575 = vmatpush.msra.mxu3 %v552_v32  ;;  %v691_v32 = vld [vmem:[%s1360_s12] sm:$0xff] }
 0x1b0   :  { %576 = vmatpush.msra.mxu3 %v550_v30 }
 0x1b2   :  { %577 = vmatpush.msra.mxu3 %v548_v28  ;;  %v695_v28 = vld [vmem:[%s1361_s13] sm:$0x1] }
 0x1b4   :  { %578 = vmatpush.msra.mxu3 %v546_v58 }
 0x1ef   :  { %v470_v15 = vpop.permute.xlu0 %469 }
 0x220   :  { %v489_v27 = vpop.f32.mrf.mxu3 }
 0x221   :  { %v490_v51 = vadd.f32 %v489_v27, %v470_v15  ;;  %v692_v15 = vld [vmem:[%s1360_s12 + $0x8] sm:$0xff] }
 0x223   :  { %v494_v40 = vsel %vm492_vm6, %v490_v51, -inf  ;;  %493 = vst.msk [vmem:[#allocation9] sm:$0xf] %vm492_vm6, %v490_v51 }
 0x224   :  { %495 = vmax.xlane.f32.xlu0 %v494_v40  ;;  %744 = dma.vmem_to_hbm [thread:$0]  %s740_s3, 64, %s742_s18, [#allocation10]  }
 0x297   :  { %v496_v38 = vpop.xlane.xlu0 %495 }
 0x298   :  { %v497_v52 = vsub.f32 %v490_v51, %v496_v38 }
 0x29a   :  { %v498_v36 = vmul.f32 1.442695, %v497_v52  ;;  %v542_v52 = vld [vmem:[%s1355_s7] sm:$0xf] }
 0x29c   :  { %847 = vpow2.f32 %v498_v36 }
 0x2a2   :  { %v848_v34 = vpop.eup %847 }
 0x2a3   :  { %v500_v53 = vsel %vm492_vm6, %v848_v34, 0.0 }
 0x2a4   :  { %501 = vadd.xlane.f32.xlu1 %v500_v53 }
 0x2bd   :  { %628 = vperm.xlu1 %798, %v625_v29  }
 0x317   :  { %v502_v26 = vpop.xlane.xlu1 %501 }
 0x318   :  { %849 = vrcp.f32 %v502_v26 }
 0x31e   :  { %v850_v54 = vpop.eup %849 }
 0x31f   :  { %v504_v57 = vmul.f32 %v850_v54, %v848_v34 }
 0x321   :  { %783 = vmatmul.msk.f32.vlgmr.msrb.gmra.mxu3 %vm102_vm0, %v504_v57 }
 0x322   :  { %595 = vmatpush.msrb.mxu3 %v553_v59 }
 0x324   :  { %596 = vmatpush.msrb.mxu3 %v551_v55 }
 0x326   :  { %597 = vmatpush.msrb.mxu3 %v549_v61 }
 0x328   :  { %598 = vmatpush.msrb.mxu3 %v547_v63 }
 0x32f   :  { %v629_v35 = vpop.permute.xlu1 %628 }
 0x330   :  { %v631_v37 = vperm.slane %v629_v35, 0 }
 0x3a4   :  { %v525_v0 = vpop.f32.mrf.mxu3 }
 0x3a5   :  { %785 = vmatmul.msk.f32.vlgmr.msra.gmra.mxu3 %vm190_vm1, %v525_v0  ;;  %787 = vmatpush.msk.msrb.mxu2 %vm668_vm7, %v525_v0  ;;  %v529_v46 = vmul.f32 %v528_v45, %v525_v0  ;;  %v536_v49 = vmul.f32 %v784_v48, %v525_v0 }
 0x3a6   :  { %711 = vmatpush.msra.mxu3 %v694_v50 }
 0x3a7   :  { %v531_v47 = vsel %vm530_vm12, %v529_v46, 0.0  ;;  %v537_v8 = vsel %vm530_vm12, %v536_v49, 0.0 }
 0x3a8   :  { %712 = vmatpush.msra.mxu3 %v693_v23 }
 0x3aa   :  { %713 = vmatpush.msra.mxu3 %v692_v15 }
 0x3ac   :  { %714 = vmatpush.msra.mxu3 %v691_v32 }
 0x3ad   :  { %786 = vmatmul.msk.f32.vlgmr.msrb.gmra.mxu3 %vm190_vm1, %v525_v0 }
 0x428   :  { %v580_v1 = vpop.f32.mrf.mxu3 }
 0x429   :  { %v581_v18 = vadd.f32 %v580_v1, %v556_v13 }
 0x430   :  { %v600_v5 = vpop.f32.mrf.mxu3 }
 0x431   :  { %v601_v6 = vadd.f32 %v600_v5, %v557_v4 }
 0x433   :  { %v604_v9 = vsub.f32 0.0, %v601_v6 }
 0x435   :  { %v605_v60 = vmul.f32 1.442695, %v604_v9 }
 0x437   :  { %851 = vpow2.f32 %v605_v60 }
 0x43d   :  { %v852_v10 = vpop.eup %851 }
 0x43e   :  { %v607_v11 = vadd.f32 1.0, %v852_v10 }
 0x440   :  { %853 = vrcp.f32 %v607_v11  ;;  %v619_v20 = vand.u32 2147483648, %v607_v11  ;;  %v617_v2 = vand.u32 2147483647, %v607_v11  ;;  %vm613_vm8 = vweird.f32 %v607_v11 }
 0x441   :  { %855 = vtanh.f32 %v581_v18 }
 0x442   :  { %v620_v24 = vor.u32 1.1754944e-38, %v619_v20  ;;  %vm618_vm10 = vcmp.eq.f32.partialorder %v617_v2, 8.507059e+37 }
 0x446   :  { %v854_v17 = vpop.eup %853 }
 0x447   :  { %v609_v7 = vmul.f32 %v854_v17, %v607_v11  ;;  %vm614_vm0 = vweird.f32 %v854_v17  ;;  %v856_v25 = vpop.eup %855 }
 0x448   :  { %vm615_vm9 = vmor %vm613_vm8, %vm614_vm0 }
 0x449   :  { %v610_v19 = vsub.f32 1.0, %v609_v7 }
 0x44b   :  { %v611_v21 = vmul.f32 %v854_v17, %v610_v19 }
 0x44d   :  { %v612_v22 = vadd.f32 %v854_v17, %v611_v21 }
 0x44f   :  { %v616_v14 = vsel %vm615_vm9, %v854_v17, %v612_v22 }
 0x450   :  { %v621_v31 = vsel %vm618_vm10, %v620_v24, %v616_v14 }
 0x451   :  { %v623_v33 = vmul.f32 %v856_v25, %v621_v31 }
 0x453   :  { %647 = vmatpush.xpose.msrb.mxu1 %v623_v33 }
 0x456   :  { %648 = vmatmul.f32.vlgmr.msrb.gmra.mxu1 %v624_v12 }
 0x4d3   :  { %v649_v39 = vpop.f32.mrf.mxu1 }
 0x4d4   :  { %v650_v41 = vadd.f32 %v649_v39, %v631_v37 }
 0x4d6   :  { %v653_v43 = vsel %vm652_vm11, %v650_v41, -inf }
 0x4d7   :  { %654 = vmax.xlane.f32.xlu2 %v653_v43 }
 0x54a   :  { %v655_v44 = vpop.xlane.xlu2 %654 }
 0x54b   :  { %v656_v56 = vsub.f32 %v650_v41, %v655_v44 }
 0x54d   :  { %v657_v62 = vmul.f32 1.442695, %v656_v56 }
 0x54f   :  { %857 = vpow2.f32 %v657_v62 }
 0x555   :  { %v858_v42 = vpop.eup %857 }
 0x556   :  { %v659_v16 = vsel %vm652_vm11, %v858_v42, 0.0 }
 0x557   :  { %660 = vadd.xlane.f32.xlu2 %v659_v16 }
 0x55f   :  { %532 = vadd.xlane.f32.xlu2 %v531_v47 }
 0x567   :  { %538 = vadd.xlane.f32.xlu2 %v537_v8 }
 0x5ca   :  { %v661_v27 = vpop.xlane.xlu2 %660 }
 0x5cb   :  { %859 = vrcp.f32 %v661_v27 }
 0x5d1   :  { %v860_v51 = vpop.eup %859 }
 0x5d2   :  { %v533_v40 = vpop.xlane.xlu2 %532  ;;  %v663_v38 = vmul.f32 %v860_v51, %v858_v42 }
 0x5d4   :  { %788 = vmatmul.msk.f32.vlgmr.msrb.gmra.mxu2 %vm664_vm13, %v663_v38 }
 0x5da   :  { %v539_v36 = vpop.xlane.xlu2 %538 }
 0x5db   :  { %v541_v34 = vsel %vm540_vm14, %v533_v40, %v539_v36 }
 0x5dc   :  { %v543_v53 = vadd.f32 %v542_v52, %v541_v34 }
 0x5de   :  { %545 = vst.msk [vmem:[%s1362_s14] sm:$0xf] %vm544_vm15, %v543_v53  ;;  %s971_s14 = smov [#allocation8]  }
 0x5df   :  { %s728_s5 = sshll.u32 %s971_s14, 4  ;;  %s729_s5 = int_to_ptr.vmem [resolvable:$true] %s728_s5 }
 0x657   :  { %v688_v30 = vpop.f32.mrf.mxu2 }
 0x658   :  { %789 = vmatmul.msk.f32.vlgmr.msra.gmra.mxu3 %vm190_vm1, %v688_v30  ;;  %vm719_vm1 = vcmask 8192  }
 0x6db   :  { %v716_v26 = vpop.f32.mrf.mxu3 }
 0x6dc   :  { %v717_v54 = vadd.f32 %v716_v26, %v695_v28 }
 0x6de   :  { %720 = vst.msk [vmem:[#allocation8] sm:$0x1] %vm719_vm1, %v717_v54 }
 0x6df   :  { %733 = dma.vmem_to_hbm [thread:$0]  %s729_s5, 16, %s731_s19, [#allocation5]  }
 0x6e0   :  { %961 = dma.done.wait [#allocation5], 16  }
 0x6e1   :  { %962 = vsyncadd [#allocation5], 4294967280 }
 0x6e2   :  { %963 = dma.done.wait [#allocation10], 64  }
 0x6e3   :  { %964 = vsyncadd [#allocation10], 4294967232 }
 0x6e4   :  { %755 = vsyncpa [#allocation4], 1 }
 0x6e5   :  { %756 = vsyncpa [#allocation7], 1 }
 0x6e6   :  { %757 = vsyncpa [#allocation5], 1 }
 0x6e7   :  { %758 = vsyncpa [#allocation10], 1 }

</bundles_post_ra>
